<compile_context>
chip_gen: v6e
topology: v6e:2x2x1
jax: 0.10.0
libtpu: 0.0.40
codegen_flags: <defaults>
</compile_context>

<pallas_src>
import functools

import jax
import jax.numpy as jnp
from jax.experimental import pallas as pl
from jax.experimental.pallas import tpu as pltpu

HIDDEN = 128
LANE = 128
NEG_INF = -1e30


def _round_up(x, m):
    return (x + m - 1) // m * m


def _actor_critic_kernel(output_size,
                         x_ref,
                         w1_ref, b1_ref, w2_ref, b2_ref, w3_ref, b3_ref,
                         wp1_ref, bp1_ref, wp2_ref, bp2_ref,
                         wv1_ref, bv1_ref, wv2_ref, bv2_ref,
                         pol_ref, val_ref):
    bf16 = jnp.bfloat16

    def dense_tanh(h, w_ref, b_ref):
        acc = jnp.dot(h.astype(bf16), w_ref[...],
                      preferred_element_type=jnp.float32)
        return jnp.tanh(acc + b_ref[...])

    # ---- shared trunk: 3 x (Linear -> tanh) ----
    z = dense_tanh(x_ref[...], w1_ref, b1_ref)
    z = dense_tanh(z, w2_ref, b2_ref)
    z = dense_tanh(z, w3_ref, b3_ref)

    # ---- policy head: Linear -> tanh -> Linear -> softmax over real lanes ----
    p = dense_tanh(z, wp1_ref, bp1_ref)
    logits = jnp.dot(p.astype(bf16), wp2_ref[...],
                     preferred_element_type=jnp.float32) + bp2_ref[...]
    lane = jax.lax.broadcasted_iota(jnp.int32, logits.shape, 1)
    logits = jnp.where(lane < output_size, logits, NEG_INF)   # mask padded lanes
    m = jnp.max(logits, axis=-1, keepdims=True)
    e = jnp.exp(logits - m)
    denom = jnp.sum(e, axis=-1, keepdims=True)
    pol_ref[...] = (e * pl.reciprocal(denom, approx=True)).astype(pol_ref.dtype)

    # ---- value head: Linear -> tanh -> (1,128)·(tm,128)^T contraction ----
    v = dense_tanh(z, wv1_ref, bv1_ref)                       # (tm, 128) f32
    # Contract over the feature axis of both operands so the result is produced
    # directly in lane-major (1, tm) layout (lane-dense store, no relayout).
    val = jax.lax.dot_general(wv2_ref[...], v,
                              dimension_numbers=(((1,), (1,)), ((), ())),
                              preferred_element_type=jnp.float32)
    val_ref[...] = (val + bv2_ref[...]).astype(val_ref.dtype)


def actor_critic_forward(x, params, *, block_rows=256, interpret=False):
    """x: (B, input_size) f32 -> (policy (B, output_size), value (B, 1)), both f32."""
    (w1, b1, w2, b2, w3, b3,
     wp1, bp1, wp2, bp2,
     wv1, bv1, wv2, bv2) = params

    B, input_size = x.shape
    hidden = w1.shape[1]
    output_size = wp2.shape[1]
    P = _round_up(output_size, LANE)                 # lane-dense policy width

    # Batch tile: 256 rows by default (amortizes per-step overhead, keeps the
    # MXU fed since hidden=128 only half-fills the 2x256 MXU on v6e/v7x), but
    # shrink for tiny batches. Rows are independent, so zero-padding is safe.
    tm = max(16, min(block_rows, _round_up(B, 16)))
    Bp = _round_up(B, tm)
    grid = (Bp // tm,)

    bf16 = jnp.bfloat16
    xp = jnp.zeros((Bp, input_size), bf16).at[:B].set(x.astype(bf16))

    # Pad the policy output layer to P lanes (kernel masks the padded logits).
    wp2p = jnp.zeros((hidden, P), bf16).at[:, :output_size].set(wp2.astype(bf16))
    bp2p = jnp.zeros((1, P), jnp.float32).at[:, :output_size].set(
        bp2.astype(jnp.float32).reshape(1, -1))

    row2 = lambda a: a.astype(jnp.float32).reshape(1, -1)
    args = (
        xp,
        w1.astype(bf16), row2(b1),
        w2.astype(bf16), row2(b2),
        w3.astype(bf16), row2(b3),
        wp1.astype(bf16), row2(bp1),
        wp2p, bp2p,
        wv1.astype(bf16), row2(bv1),
        wv2.astype(jnp.float32).reshape(1, hidden),   # value-head weight row (f32)
        row2(bv2),                                    # (1, 1)
    )

    x_spec = pl.BlockSpec((tm, input_size), lambda i: (i, 0))
    const = lambda i: (0, 0)
    param_specs = [pl.BlockSpec(a.shape, const) for a in args[1:]]  # stay resident

    pol_pad, val_row = pl.pallas_call(
        functools.partial(_actor_critic_kernel, output_size),
        grid=grid,
        in_specs=[x_spec] + param_specs,
        out_specs=[
            pl.BlockSpec((tm, P), lambda i: (i, 0)),      # lane-dense policy tile
            pl.BlockSpec((1, tm), lambda i: (0, i)),      # lane-dense value row
        ],
        out_shape=[
            jax.ShapeDtypeStruct((Bp, P), jnp.float32),
            jax.ShapeDtypeStruct((1, Bp), jnp.float32),
        ],
        compiler_params=pltpu.CompilerParams(
            dimension_semantics=("parallel",),            # both TCs on v7x
            vmem_limit_bytes=32 * 1024 * 1024,            # fits v5e/v6e/v7x
        ),
        interpret=interpret,
    )(*args)

    policy = pol_pad[:B, :output_size]
    value = val_row.reshape(-1)[:B].reshape(B, 1)
    return policy, value


def init_params(key, input_size, output_size, hidden=HIDDEN):
    """Deterministic parameters matching the PyTorch module's layer shapes.

    Linear weights are stored pre-transposed as (in_features, out_features)."""
    ks = jax.random.split(key, 14)

    def lin(kw, kb, fan_in, fan_out):
        bound = 1.0 / (fan_in ** 0.5)
        w = jax.random.uniform(kw, (fan_in, fan_out), jnp.float32, -bound, bound)
        b = jax.random.uniform(kb, (fan_out,), jnp.float32, -bound, bound)
        return w, b

    w1, b1 = lin(ks[0], ks[1], input_size, hidden)
    w2, b2 = lin(ks[2], ks[3], hidden, hidden)
    w3, b3 = lin(ks[4], ks[5], hidden, hidden)
    wp1, bp1 = lin(ks[6], ks[7], hidden, hidden)
    wp2, bp2 = lin(ks[8], ks[9], hidden, output_size)
    wv1, bv1 = lin(ks[10], ks[11], hidden, hidden)
    wv2, bv2 = lin(ks[12], ks[13], hidden, 1)
    return (w1, b1, w2, b2, w3, b3, wp1, bp1, wp2, bp2, wv1, bv1, wv2, bv2)


def reference_forward(x, params):
    """Pure-JAX f32 reference of the PyTorch forward pass."""
    (w1, b1, w2, b2, w3, b3,
     wp1, bp1, wp2, bp2,
     wv1, bv1, wv2, bv2) = params
    z = jnp.tanh(x @ w1 + b1)
    z = jnp.tanh(z @ w2 + b2)
    z = jnp.tanh(z @ w3 + b3)
    p = jnp.tanh(z @ wp1 + bp1)
    policy = jax.nn.softmax(p @ wp2 + bp2, axis=-1)
    v = jnp.tanh(z @ wv1 + bv1)
    value = v @ wv2 + bv2
    return policy, value


if __name__ == "__main__":
    key = jax.random.PRNGKey(0)
    kx, kp = jax.random.split(key)

    batch, input_size, output_size = 8, 32, 4
    x = jax.random.normal(kx, (batch, input_size), jnp.float32)
    params = init_params(kp, input_size, output_size)

    policy, value = actor_critic_forward(x, params)
    policy, value = jax.block_until_ready((policy, value))

    pol_ref, val_ref = reference_forward(x, params)

    assert policy.shape == (batch, output_size), policy.shape
    assert value.shape == (batch, 1), value.shape
    # softmax rows must sum to 1 (padded lanes are masked out inside the kernel)
    assert jnp.allclose(jnp.sum(policy, axis=-1), 1.0, atol=1e-2)
    # Loose tolerance accounts for bf16 MXU inputs + approx softmax reciprocal.
    assert jnp.allclose(policy, pol_ref, atol=3e-2, rtol=3e-2), (
        f"policy max abs err {jnp.max(jnp.abs(policy - pol_ref))}")
    assert jnp.allclose(value, val_ref, atol=3e-2, rtol=3e-2), (
        f"value max abs err {jnp.max(jnp.abs(value - val_ref))}")

    print("KERNEL_OK")
</pallas_src>

<mosaic_0001>
module attributes {stable_mosaic.version = 11 : i64} {
  func.func @_actor_critic_kernel(%arg0: i32, %arg1: memref<16x32xbf16, #tpu.memory_space<vmem>>, %arg2: memref<32x128xbf16, #tpu.memory_space<vmem>>, %arg3: memref<1x128xf32, #tpu.memory_space<vmem>>, %arg4: memref<128x128xbf16, #tpu.memory_space<vmem>>, %arg5: memref<1x128xf32, #tpu.memory_space<vmem>>, %arg6: memref<128x128xbf16, #tpu.memory_space<vmem>>, %arg7: memref<1x128xf32, #tpu.memory_space<vmem>>, %arg8: memref<128x128xbf16, #tpu.memory_space<vmem>>, %arg9: memref<1x128xf32, #tpu.memory_space<vmem>>, %arg10: memref<128x128xbf16, #tpu.memory_space<vmem>>, %arg11: memref<1x128xf32, #tpu.memory_space<vmem>>, %arg12: memref<128x128xbf16, #tpu.memory_space<vmem>>, %arg13: memref<1x128xf32, #tpu.memory_space<vmem>>, %arg14: memref<1x128xf32, #tpu.memory_space<vmem>>, %arg15: memref<1x1xf32, #tpu.memory_space<vmem>>, %arg16: memref<16x128xf32, #tpu.memory_space<vmem>>, %arg17: memref<1x16xf32, #tpu.memory_space<vmem>>) attributes {dimension_semantics = [#tpu.dimension_semantics<parallel>], iteration_bounds = array<i64: 1>, scalar_prefetch = 0 : i64, scratch_operands = 0 : i64, tpu.core_type = #tpu.core_type<tc>, window_params = [{transform_indices = @transform_0, window_bounds = array<i64: 16, 32>}, {pipeline_mode = #tpu.pipeline_mode<synchronous>, transform_indices = @transform_1, window_bounds = array<i64: 32, 128>}, {pipeline_mode = #tpu.pipeline_mode<synchronous>, transform_indices = @transform_2, window_bounds = array<i64: 1, 128>}, {pipeline_mode = #tpu.pipeline_mode<synchronous>, transform_indices = @transform_3, window_bounds = array<i64: 128, 128>}, {pipeline_mode = #tpu.pipeline_mode<synchronous>, transform_indices = @transform_4, window_bounds = array<i64: 1, 128>}, {pipeline_mode = #tpu.pipeline_mode<synchronous>, transform_indices = @transform_5, window_bounds = array<i64: 128, 128>}, {pipeline_mode = #tpu.pipeline_mode<synchronous>, transform_indices = @transform_6, window_bounds = array<i64: 1, 128>}, {pipeline_mode = #tpu.pipeline_mode<synchronous>, transform_indices = @transform_7, window_bounds = array<i64: 128, 128>}, {pipeline_mode = #tpu.pipeline_mode<synchronous>, transform_indices = @transform_8, window_bounds = array<i64: 1, 128>}, {pipeline_mode = #tpu.pipeline_mode<synchronous>, transform_indices = @transform_9, window_bounds = array<i64: 128, 128>}, {pipeline_mode = #tpu.pipeline_mode<synchronous>, transform_indices = @transform_10, window_bounds = array<i64: 1, 128>}, {pipeline_mode = #tpu.pipeline_mode<synchronous>, transform_indices = @transform_11, window_bounds = array<i64: 128, 128>}, {pipeline_mode = #tpu.pipeline_mode<synchronous>, transform_indices = @transform_12, window_bounds = array<i64: 1, 128>}, {pipeline_mode = #tpu.pipeline_mode<synchronous>, transform_indices = @transform_13, window_bounds = array<i64: 1, 128>}, {pipeline_mode = #tpu.pipeline_mode<synchronous>, transform_indices = @transform_14, window_bounds = array<i64: 1, 1>}, {transform_indices = @transform_15, window_bounds = array<i64: 16, 128>}, {transform_indices = @transform_16, window_bounds = array<i64: 1, 16>}]} {
    %c0 = arith.constant 0 : index
    %c0_0 = arith.constant 0 : index
    %0 = vector.load %arg1[%c0, %c0_0] : memref<16x32xbf16, #tpu.memory_space<vmem>>, vector<16x32xbf16>
    %c0_1 = arith.constant 0 : index
    %c0_2 = arith.constant 0 : index
    %1 = vector.load %arg2[%c0_1, %c0_2] : memref<32x128xbf16, #tpu.memory_space<vmem>>, vector<32x128xbf16>
    %cst = arith.constant dense<0.000000e+00> : vector<16x128xf32>
    %2 = tpu.matmul %0, %1, %cst {dimension_numbers = #tpu.dot_dimension_numbers<[1], [0], [0], [1], [0, 0, 1, 1], [], []>} : vector<16x32xbf16>, vector<32x128xbf16>, vector<16x128xf32> -> vector<16x128xf32>
    %c0_3 = arith.constant 0 : index
    %c0_4 = arith.constant 0 : index
    %3 = vector.load %arg3[%c0_3, %c0_4] : memref<1x128xf32, #tpu.memory_space<vmem>>, vector<1x128xf32>
    %4 = vector.broadcast %3 : vector<1x128xf32> to vector<16x128xf32>
    %5 = arith.addf %2, %4 : vector<16x128xf32>
    %6 = math.tanh %5 : vector<16x128xf32>
    %7 = arith.truncf %6 : vector<16x128xf32> to vector<16x128xbf16>
    %c0_5 = arith.constant 0 : index
    %c0_6 = arith.constant 0 : index
    %8 = vector.load %arg4[%c0_5, %c0_6] : memref<128x128xbf16, #tpu.memory_space<vmem>>, vector<128x128xbf16>
    %cst_7 = arith.constant dense<0.000000e+00> : vector<16x128xf32>
    %9 = tpu.matmul %7, %8, %cst_7 {dimension_numbers = #tpu.dot_dimension_numbers<[1], [0], [0], [1], [0, 0, 1, 1], [], []>} : vector<16x128xbf16>, vector<128x128xbf16>, vector<16x128xf32> -> vector<16x128xf32>
    %c0_8 = arith.constant 0 : index
    %c0_9 = arith.constant 0 : index
    %10 = vector.load %arg5[%c0_8, %c0_9] : memref<1x128xf32, #tpu.memory_space<vmem>>, vector<1x128xf32>
    %11 = vector.broadcast %10 : vector<1x128xf32> to vector<16x128xf32>
    %12 = arith.addf %9, %11 : vector<16x128xf32>
    %13 = math.tanh %12 : vector<16x128xf32>
    %14 = arith.truncf %13 : vector<16x128xf32> to vector<16x128xbf16>
    %c0_10 = arith.constant 0 : index
    %c0_11 = arith.constant 0 : index
    %15 = vector.load %arg6[%c0_10, %c0_11] : memref<128x128xbf16, #tpu.memory_space<vmem>>, vector<128x128xbf16>
    %cst_12 = arith.constant dense<0.000000e+00> : vector<16x128xf32>
    %16 = tpu.matmul %14, %15, %cst_12 {dimension_numbers = #tpu.dot_dimension_numbers<[1], [0], [0], [1], [0, 0, 1, 1], [], []>} : vector<16x128xbf16>, vector<128x128xbf16>, vector<16x128xf32> -> vector<16x128xf32>
    %c0_13 = arith.constant 0 : index
    %c0_14 = arith.constant 0 : index
    %17 = vector.load %arg7[%c0_13, %c0_14] : memref<1x128xf32, #tpu.memory_space<vmem>>, vector<1x128xf32>
    %18 = vector.broadcast %17 : vector<1x128xf32> to vector<16x128xf32>
    %19 = arith.addf %16, %18 : vector<16x128xf32>
    %20 = math.tanh %19 : vector<16x128xf32>
    %21 = arith.truncf %20 : vector<16x128xf32> to vector<16x128xbf16>
    %c0_15 = arith.constant 0 : index
    %c0_16 = arith.constant 0 : index
    %22 = vector.load %arg8[%c0_15, %c0_16] : memref<128x128xbf16, #tpu.memory_space<vmem>>, vector<128x128xbf16>
    %cst_17 = arith.constant dense<0.000000e+00> : vector<16x128xf32>
    %23 = tpu.matmul %21, %22, %cst_17 {dimension_numbers = #tpu.dot_dimension_numbers<[1], [0], [0], [1], [0, 0, 1, 1], [], []>} : vector<16x128xbf16>, vector<128x128xbf16>, vector<16x128xf32> -> vector<16x128xf32>
    %c0_18 = arith.constant 0 : index
    %c0_19 = arith.constant 0 : index
    %24 = vector.load %arg9[%c0_18, %c0_19] : memref<1x128xf32, #tpu.memory_space<vmem>>, vector<1x128xf32>
    %25 = vector.broadcast %24 : vector<1x128xf32> to vector<16x128xf32>
    %26 = arith.addf %23, %25 : vector<16x128xf32>
    %27 = math.tanh %26 : vector<16x128xf32>
    %28 = arith.truncf %27 : vector<16x128xf32> to vector<16x128xbf16>
    %c0_20 = arith.constant 0 : index
    %c0_21 = arith.constant 0 : index
    %29 = vector.load %arg10[%c0_20, %c0_21] : memref<128x128xbf16, #tpu.memory_space<vmem>>, vector<128x128xbf16>
    %cst_22 = arith.constant dense<0.000000e+00> : vector<16x128xf32>
    %30 = tpu.matmul %28, %29, %cst_22 {dimension_numbers = #tpu.dot_dimension_numbers<[1], [0], [0], [1], [0, 0, 1, 1], [], []>} : vector<16x128xbf16>, vector<128x128xbf16>, vector<16x128xf32> -> vector<16x128xf32>
    %c0_23 = arith.constant 0 : index
    %c0_24 = arith.constant 0 : index
    %31 = vector.load %arg11[%c0_23, %c0_24] : memref<1x128xf32, #tpu.memory_space<vmem>>, vector<1x128xf32>
    %32 = vector.broadcast %31 : vector<1x128xf32> to vector<16x128xf32>
    %33 = arith.addf %30, %32 : vector<16x128xf32>
    %34 = tpu.iota {dimensions = array<i32: 1>} : vector<16x128xi32>
    %c4_i32 = arith.constant 4 : i32
    %35 = vector.broadcast %c4_i32 : i32 to vector<16x128xi32>
    %36 = arith.cmpi slt, %34, %35 : vector<16x128xi32>
    %cst_25 = arith.constant -1.000000e+30 : f32
    %37 = vector.broadcast %cst_25 : f32 to vector<16x128xf32>
    %38 = arith.select %36, %33, %37 : vector<16x128xi1>, vector<16x128xf32>
    %cst_26 = arith.constant dense<0xFF800000> : vector<16xf32>
    %39 = vector.multi_reduction <maximumf>, %38, %cst_26 [1] : vector<16x128xf32> to vector<16xf32>
    %40 = vector.shape_cast %39 : vector<16xf32> to vector<16x1xf32>
    %41 = vector.broadcast %40 : vector<16x1xf32> to vector<16x128xf32>
    %42 = arith.subf %38, %41 : vector<16x128xf32>
    %43 = math.exp %42 : vector<16x128xf32>
    %cst_27 = arith.constant dense<0.000000e+00> : vector<16xf32>
    %44 = vector.multi_reduction <add>, %43, %cst_27 [1] : vector<16x128xf32> to vector<16xf32>
    %45 = vector.shape_cast %44 : vector<16xf32> to vector<16x1xf32>
    %46 = tpu.reciprocal %45 {approx = true} : vector<16x1xf32> -> vector<16x1xf32>
    %47 = vector.broadcast %46 : vector<16x1xf32> to vector<16x128xf32>
    %48 = arith.mulf %43, %47 : vector<16x128xf32>
    %c0_28 = arith.constant 0 : index
    %c0_29 = arith.constant 0 : index
    %49 = vector.load %arg16[%c0_28, %c0_29] : memref<16x128xf32, #tpu.memory_space<vmem>>, vector<16x128xf32>
    tpu.vector_store %arg16[%c0_28, %c0_29], %48 {strides = array<i32>} : memref<16x128xf32, #tpu.memory_space<vmem>>, vector<16x128xf32>,
    %50 = arith.truncf %20 : vector<16x128xf32> to vector<16x128xbf16>
    %c0_30 = arith.constant 0 : index
    %c0_31 = arith.constant 0 : index
    %51 = vector.load %arg12[%c0_30, %c0_31] : memref<128x128xbf16, #tpu.memory_space<vmem>>, vector<128x128xbf16>
    %cst_32 = arith.constant dense<0.000000e+00> : vector<16x128xf32>
    %52 = tpu.matmul %50, %51, %cst_32 {dimension_numbers = #tpu.dot_dimension_numbers<[1], [0], [0], [1], [0, 0, 1, 1], [], []>} : vector<16x128xbf16>, vector<128x128xbf16>, vector<16x128xf32> -> vector<16x128xf32>
    %c0_33 = arith.constant 0 : index
    %c0_34 = arith.constant 0 : index
    %53 = vector.load %arg13[%c0_33, %c0_34] : memref<1x128xf32, #tpu.memory_space<vmem>>, vector<1x128xf32>
    %54 = vector.broadcast %53 : vector<1x128xf32> to vector<16x128xf32>
    %55 = arith.addf %52, %54 : vector<16x128xf32>
    %56 = math.tanh %55 : vector<16x128xf32>
    %c0_35 = arith.constant 0 : index
    %c0_36 = arith.constant 0 : index
    %57 = vector.load %arg14[%c0_35, %c0_36] : memref<1x128xf32, #tpu.memory_space<vmem>>, vector<1x128xf32>
    %cst_37 = arith.constant dense<0.000000e+00> : vector<1x16xf32>
    %58 = tpu.matmul %57, %56, %cst_37 {dimension_numbers = #tpu.dot_dimension_numbers<[1], [1], [0], [0], [0, 0, 1, 0], [], []>} : vector<1x128xf32>, vector<16x128xf32>, vector<1x16xf32> -> vector<1x16xf32>
    %c0_38 = arith.constant 0 : index
    %c0_39 = arith.constant 0 : index
    %59 = vector.load %arg15[%c0_38, %c0_39] : memref<1x1xf32, #tpu.memory_space<vmem>>, vector<1x1xf32>
    %60 = vector.broadcast %59 : vector<1x1xf32> to vector<1x16xf32>
    %61 = arith.addf %58, %60 : vector<1x16xf32>
    %c0_40 = arith.constant 0 : index
    %c0_41 = arith.constant 0 : index
    %62 = vector.load %arg17[%c0_40, %c0_41] : memref<1x16xf32, #tpu.memory_space<vmem>>, vector<1x16xf32>
    tpu.vector_store %arg17[%c0_40, %c0_41], %61 {strides = array<i32>} : memref<1x16xf32, #tpu.memory_space<vmem>>, vector<1x16xf32>,
    return
  }
  func.func @transform_0(%arg0: i32) -> (i32, i32) {
    %c0_i32 = arith.constant 0 : i32
    %c0_i32_0 = arith.constant 0 : i32
    return %arg0, %c0_i32 : i32, i32
  }
  func.func @transform_1(%arg0: i32) -> (i32, i32) {
    %c0_i32 = arith.constant 0 : i32
    %c0_i32_0 = arith.constant 0 : i32
    %c0_i32_1 = arith.constant 0 : i32
    return %c0_i32, %c0_i32_0 : i32, i32
  }
  func.func @transform_2(%arg0: i32) -> (i32, i32) {
    %c0_i32 = arith.constant 0 : i32
    %c0_i32_0 = arith.constant 0 : i32
    %c0_i32_1 = arith.constant 0 : i32
    return %c0_i32, %c0_i32_0 : i32, i32
  }
  func.func @transform_3(%arg0: i32) -> (i32, i32) {
    %c0_i32 = arith.constant 0 : i32
    %c0_i32_0 = arith.constant 0 : i32
    %c0_i32_1 = arith.constant 0 : i32
    return %c0_i32, %c0_i32_0 : i32, i32
  }
  func.func @transform_4(%arg0: i32) -> (i32, i32) {
    %c0_i32 = arith.constant 0 : i32
    %c0_i32_0 = arith.constant 0 : i32
    %c0_i32_1 = arith.constant 0 : i32
    return %c0_i32, %c0_i32_0 : i32, i32
  }
  func.func @transform_5(%arg0: i32) -> (i32, i32) {
    %c0_i32 = arith.constant 0 : i32
    %c0_i32_0 = arith.constant 0 : i32
    %c0_i32_1 = arith.constant 0 : i32
    return %c0_i32, %c0_i32_0 : i32, i32
  }
  func.func @transform_6(%arg0: i32) -> (i32, i32) {
    %c0_i32 = arith.constant 0 : i32
    %c0_i32_0 = arith.constant 0 : i32
    %c0_i32_1 = arith.constant 0 : i32
    return %c0_i32, %c0_i32_0 : i32, i32
  }
  func.func @transform_7(%arg0: i32) -> (i32, i32) {
    %c0_i32 = arith.constant 0 : i32
    %c0_i32_0 = arith.constant 0 : i32
    %c0_i32_1 = arith.constant 0 : i32
    return %c0_i32, %c0_i32_0 : i32, i32
  }
  func.func @transform_8(%arg0: i32) -> (i32, i32) {
    %c0_i32 = arith.constant 0 : i32
    %c0_i32_0 = arith.constant 0 : i32
    %c0_i32_1 = arith.constant 0 : i32
    return %c0_i32, %c0_i32_0 : i32, i32
  }
  func.func @transform_9(%arg0: i32) -> (i32, i32) {
    %c0_i32 = arith.constant 0 : i32
    %c0_i32_0 = arith.constant 0 : i32
    %c0_i32_1 = arith.constant 0 : i32
    return %c0_i32, %c0_i32_0 : i32, i32
  }
  func.func @transform_10(%arg0: i32) -> (i32, i32) {
    %c0_i32 = arith.constant 0 : i32
    %c0_i32_0 = arith.constant 0 : i32
    %c0_i32_1 = arith.constant 0 : i32
    return %c0_i32, %c0_i32_0 : i32, i32
  }
  func.func @transform_11(%arg0: i32) -> (i32, i32) {
    %c0_i32 = arith.constant 0 : i32
    %c0_i32_0 = arith.constant 0 : i32
    %c0_i32_1 = arith.constant 0 : i32
    return %c0_i32, %c0_i32_0 : i32, i32
  }
  func.func @transform_12(%arg0: i32) -> (i32, i32) {
    %c0_i32 = arith.constant 0 : i32
    %c0_i32_0 = arith.constant 0 : i32
    %c0_i32_1 = arith.constant 0 : i32
    return %c0_i32, %c0_i32_0 : i32, i32
  }
  func.func @transform_13(%arg0: i32) -> (i32, i32) {
    %c0_i32 = arith.constant 0 : i32
    %c0_i32_0 = arith.constant 0 : i32
    %c0_i32_1 = arith.constant 0 : i32
    return %c0_i32, %c0_i32_0 : i32, i32
  }
  func.func @transform_14(%arg0: i32) -> (i32, i32) {
    %c0_i32 = arith.constant 0 : i32
    %c0_i32_0 = arith.constant 0 : i32
    %c0_i32_1 = arith.constant 0 : i32
    return %c0_i32, %c0_i32_0 : i32, i32
  }
  func.func @transform_15(%arg0: i32) -> (i32, i32) {
    %c0_i32 = arith.constant 0 : i32
    %c0_i32_0 = arith.constant 0 : i32
    return %arg0, %c0_i32 : i32, i32
  }
  func.func @transform_16(%arg0: i32) -> (i32, i32) {
    %c0_i32 = arith.constant 0 : i32
    %c0_i32_0 = arith.constant 0 : i32
    return %c0_i32, %arg0 : i32, i32
  }
}

</mosaic_0001>

<bundles_post_ra>
// kernel: tpu_custom_call.1
= control target key start
LH: loop header
LB: loop body
LE: loop exit
PB: predicated region body
PF: predicated region fallthrough
CT: control target
= control target key end

     0   :  { %s1670_s0 = inlined_call_operand.hbm [shape: bf16[16,32], index: 0, kind: input, shape index: {}]   ;;  %s1671_s1 = inlined_call_operand.hbm [shape: bf16[32,128], index: 1, kind: input, shape index: {}]   ;;  %s1672_s2 = inlined_call_operand.vmem [shape: f32[1,128], index: 2, kind: input, shape index: {}]   ;;  %s1673_s3 = inlined_call_operand.hbm [shape: bf16[128,128], index: 3, kind: input, shape index: {}]   ;;  %s1674_s4 = inlined_call_operand.vmem [shape: f32[1,128], index: 4, kind: input, shape index: {}]   ;;  %s1675_s5 = inlined_call_operand.hbm [shape: bf16[128,128], index: 5, kind: input, shape index: {}]   ;;  %s1676_s6 = inlined_call_operand.vmem [shape: f32[1,128], index: 6, kind: input, shape index: {}]   ;;  %s1677_s7 = inlined_call_operand.hbm [shape: bf16[128,128], index: 7, kind: input, shape index: {}]   ;;  %s1678_s8 = inlined_call_operand.vmem [shape: f32[1,128], index: 8, kind: input, shape index: {}]   ;;  %s1679_s9 = inlined_call_operand.hbm [shape: bf16[128,128], index: 9, kind: input, shape index: {}]   ;;  %s1680_s10 = inlined_call_operand.vmem [shape: f32[1,128], index: 10, kind: input, shape index: {}]   ;;  %s1681_s11 = inlined_call_operand.hbm [shape: bf16[128,128], index: 11, kind: input, shape index: {}]   ;;  %s1682_s12 = inlined_call_operand.vmem [shape: f32[1,128], index: 12, kind: input, shape index: {}]   ;;  %s1683_s13 = inlined_call_operand.vmem [shape: f32[1,128], index: 13, kind: input, shape index: {}]   ;;  %s1684_s14 = inlined_call_operand.<no memory space> [shape: f32[1,1], index: 14, kind: input, shape index: {}]   ;;  %s1685_s15 = inlined_call_operand.hbm [shape: f32[16,128], index: 15, kind: output, shape index: {0}]   ;;  %s1686_s16 = inlined_call_operand.hbm [shape: f32[1,16], index: 16, kind: output, shape index: {1}]  }
   0x1   :  { %1687 = sst [smem:[#allocation24_spill]] %s1670_s0  ;;  %v22_v0 = vstv %s1684_s14 }
   0x2   :  { %23 = vst [vmem:[#allocation2] sm:$0x1] %v22_v0 }
   0x3   :  { %24 = vsyncpa [#allocation4], 0 }
   0x4   :  { %25 = vsyncpa [#allocation7], 0 }
   0x5   :  { %26 = vsyncpa [#allocation10], 0 }
   0x6   :  { %27 = vsyncpa [#allocation13], 0 }
   0x7   :  { %28 = vsyncpa [#allocation5], 0 }
   0x8   :  { %29 = vsyncpa [#allocation17], 0  ;;  %s1439_s23 = smov [#allocation6]   ;;  %s1440_s25 = smov [#allocation9]  }
   0x9   :  { %s47_s24 = sshll.u32 %s1439_s23, 4  ;;  %s75_s26 = sshll.u32 %s1440_s25, 4  ;;  %s48_s24 = int_to_ptr.vmem [resolvable:$true] %s47_s24  ;;  %s76_s26 = int_to_ptr.vmem [resolvable:$true] %s75_s26 }
   0xa   :  { %s1255_s27 = scalar_lea.vmem %s48_s24, 256  ;;  %p1260_p1 = scmp.lt.s32.totalorder %s48_s24, %s48_s24 }
   0xb   :  { %p1256_p0 = scmp.ne.s32.totalorder %s48_s24, %s1255_s27  ;;  %p1261_p2 = scmp.lt.s32.totalorder %s1255_s27, %s1255_s27 }
   0xd   :  { %p1262_p3 = por %p1261_p2, %p1260_p1 }
   0xf   :  { %p1263_p4 = pnand %p1262_p3, %p1256_p0 }
  0x11   :  { %1266 = shalt.err (!%p1263_p4)
}
  0x12   :  { %s1441_s14 = smov 64   ;;  %s1442_s28 = smov 4  }
  0x13   :  { %53 = dma.hbm_to_vmem [thread:$0]  %s1671_s1, 256, %s48_s24, [#allocation7], %s1441_s14, %s1441_s14, %s1442_s28  }
  0x14   :  { %s1275_s0 = scalar_lea.vmem %s76_s26, 1024  ;;  %p1280_p6 = scmp.lt.s32.totalorder %s76_s26, %s76_s26 }
  0x15   :  { %p1276_p5 = scmp.ne.s32.totalorder %s76_s26, %s1275_s0  ;;  %p1281_p7 = scmp.lt.s32.totalorder %s1275_s0, %s1275_s0 }
  0x17   :  { %p1282_p8 = por %p1281_p7, %p1280_p6 }
  0x19   :  { %p1283_p9 = pnand %p1282_p8, %p1276_p5 }
  0x1b   :  { %1286 = shalt.err (!%p1283_p9)
}
  0x1c   :  { %81 = dma.hbm_to_vmem [thread:$0]  %s1675_s5, 1024, %s76_s26, [#allocation10], %s1441_s14, %s1441_s14, %s1442_s28  }
  0x1d   :  { %s1443_s19 = smov [#allocation12]   ;;  %s1444_s21 = smov [#allocation3]  }
  0x1e   :  { %s103_s20 = sshll.u32 %s1443_s19, 4  ;;  %s35_s22 = sshll.u32 %s1444_s21, 4  ;;  %s104_s20 = int_to_ptr.vmem [resolvable:$true] %s103_s20  ;;  %s36_s22 = int_to_ptr.vmem [resolvable:$true] %s35_s22 }
  0x1f   :  { %s1295_s1 = scalar_lea.vmem %s104_s20, 1024  ;;  %p1300_p11 = scmp.lt.s32.totalorder %s104_s20, %s104_s20 }
  0x20   :  { %p1296_p10 = scmp.ne.s32.totalorder %s104_s20, %s1295_s1  ;;  %p1301_p12 = scmp.lt.s32.totalorder %s1295_s1, %s1295_s1 }
  0x22   :  { %p1302_p13 = por %p1301_p12, %p1300_p11 }
  0x24   :  { %p1303_p0 = pnand %p1302_p13, %p1296_p10 }
  0x26   :  { %1306 = shalt.err (!%p1303_p0)
}
  0x27   :  { %109 = dma.hbm_to_vmem [thread:$0]  %s1679_s9, 1024, %s104_s20, [#allocation13], %s1441_s14, %s1441_s14, %s1442_s28  }
  0x28   :  { %s1315_s5 = scalar_lea.vmem %s36_s22, 128  ;;  %p1320_p2 = scmp.lt.s32.totalorder %s36_s22, %s36_s22 }
  0x29   :  { %p1316_p1 = scmp.ne.s32.totalorder %s36_s22, %s1315_s5  ;;  %p1321_p3 = scmp.lt.s32.totalorder %s1315_s5, %s1315_s5 }
  0x2b   :  { %p1322_p4 = por %p1321_p3, %p1320_p2 }
  0x2d   :  { %p1323_p5 = pnand %p1322_p4, %p1316_p1 }
  0x2f   :  { %1326 = shalt.err (!%p1323_p5)
}
  0x30   :  { %s1688_s27 = sld [smem:[#allocation24_spill]]  ;;  %s1445_s29 = smov [#allocation8]  }
  0x31   :  { %s61_s30 = sshll.u32 %s1445_s29, 4  ;;  %s1446_s0 = smov [#allocation11]   ;;  %s62_s30 = int_to_ptr.vmem [resolvable:$true] %s61_s30 }
  0x32   :  { %s89_s17 = sshll.u32 %s1446_s0, 4  ;;  %s1335_s9 = scalar_lea.vmem %s62_s30, 1024  ;;  %s90_s17 = int_to_ptr.vmem [resolvable:$true] %s89_s17 }
  0x33   :  { %p1336_p6 = scmp.ne.s32.totalorder %s62_s30, %s1335_s9  ;;  %p1340_p7 = scmp.lt.s32.totalorder %s62_s30, %s62_s30 }
  0x34   :  { %p1341_p8 = scmp.lt.s32.totalorder %s1335_s9, %s1335_s9 }
  0x36   :  { %41 = dma.hbm_to_vmem [thread:$0]  %s1688_s27, 128, %s36_s22, [#allocation4], %s1441_s14, %s1441_s14, %s1442_s28  }
  0x37   :  { %p1342_p9 = por %p1341_p8, %p1340_p7 }
  0x39   :  { %p1343_p10 = pnand %p1342_p9, %p1336_p6 }
  0x3b   :  { %1346 = shalt.err (!%p1343_p10)
}
  0x3c   :  { %67 = dma.hbm_to_vmem [thread:$0]  %s1673_s3, 1024, %s62_s30, [#allocation7], %s1441_s14, %s1441_s14, %s1442_s28  }
  0x3d   :  { %s1355_s20 = scalar_lea.vmem %s90_s17, 1024  ;;  %p1360_p12 = scmp.lt.s32.totalorder %s90_s17, %s90_s17 }
  0x3e   :  { %p1356_p11 = scmp.ne.s32.totalorder %s90_s17, %s1355_s20  ;;  %p1361_p13 = scmp.lt.s32.totalorder %s1355_s20, %s1355_s20 }
  0x40   :  { %p1362_p0 = por %p1361_p13, %p1360_p12 }
  0x42   :  { %p1363_p1 = pnand %p1362_p0, %p1356_p11 }
  0x44   :  { %1366 = shalt.err (!%p1363_p1)
}
  0x45   :  { %95 = dma.hbm_to_vmem [thread:$0]  %s1677_s7, 1024, %s90_s17, [#allocation10], %s1441_s14, %s1441_s14, %s1442_s28  }
  0x46   :  { %s1447_s1 = smov [#allocation14]  }
  0x47   :  { %s117_s23 = sshll.u32 %s1447_s1, 4  ;;  %s118_s23 = int_to_ptr.vmem [resolvable:$true] %s117_s23 }
  0x48   :  { %s1375_s24 = scalar_lea.vmem %s118_s23, 1024  ;;  %p1380_p3 = scmp.lt.s32.totalorder %s118_s23, %s118_s23 }
  0x49   :  { %p1376_p2 = scmp.ne.s32.totalorder %s118_s23, %s1375_s24  ;;  %p1381_p4 = scmp.lt.s32.totalorder %s1375_s24, %s1375_s24 }
  0x4b   :  { %p1382_p5 = por %p1381_p4, %p1380_p3 }
  0x4d   :  { %p1383_p6 = pnand %p1382_p5, %p1376_p2 }
  0x4f   :  { %1386 = shalt.err (!%p1383_p6)
}
  0x50   :  { %123 = dma.hbm_to_vmem [thread:$0]  %s1681_s11, 1024, %s118_s23, [#allocation13], %s1441_s14, %s1441_s14, %s1442_s28  }
  0x51   :  { %1427 = dma.done.wait [#allocation4], 128  }
  0x52   :  { %1428 = vsyncadd [#allocation4], 4294967168 }
  0x53   :  { %1429 = dma.done.wait [#allocation7], 1280  }
  0x54   :  { %1430 = vsyncadd [#allocation7], 4294966016 }
  0x55   :  { %1431 = dma.done.wait [#allocation10], 2048  }
  0x56   :  { %1432 = vsyncadd [#allocation10], 4294965248 }
  0x57   :  { %1433 = dma.done.wait [#allocation13], 2048  }
  0x58   :  { %1434 = vsyncadd [#allocation13], 4294965248  ;;  %v1448_v1 = vmov 0.0   ;;  %vm1449_vm0 = vmmov 0   ;;  %v1176_v2 = vld [vmem:[#allocation6 + $0x8] sm:$0xff]   ;;  %v1177_v3 = vld [vmem:[#allocation6] sm:$0xff]  }
  0x59   :  { %1044 = vmatprep.subr.bf16.mxu0 %v1448_v1  ;;  %1048 = vmatprep.mubr.msk.bf16.mxu0 %vm1449_vm0, %v1448_v1  ;;  %v1179_v4 = vld [vmem:[#allocation8 + $0x38] sm:$0xff]   ;;  %v1178_v5 = vld [vmem:[#allocation3] sm:$0xff]   ;;  %vm182_vm1 = vcmask 261120   ;;  %v1180_v6 = vld [vmem:[#allocation8 + $0x30] sm:$0xff]   ;;  %vm907_vm3 = vcmask 122880  }
  0x5a   :  { %1052 = vmatprep.subr.bf16.mxu1 %v1448_v1  ;;  %1068 = vmatprep.mubr.msk.bf16.mxu1 %vm1449_vm0, %v1448_v1  ;;  %v1181_v7 = vld [vmem:[#allocation8 + $0x28] sm:$0xff]   ;;  %v1182_v8 = vld [vmem:[#allocation8 + $0x20] sm:$0xff]   ;;  %v1183_v9 = vld [vmem:[#allocation8 + $0x18] sm:$0xff]  }
  0x5b   :  { %1045 = vmatpush3.bf16.msra.mxu0 %v1176_v2  ;;  %1053 = vmatpush3.bf16.msra.mxu1 %v1179_v4  ;;  %v1184_v10 = vld [vmem:[#allocation8 + $0x10] sm:$0xff]   ;;  %v1185_v11 = vld [vmem:[#allocation8 + $0x8] sm:$0xff]   ;;  %v1186_v12 = vld [vmem:[#allocation8] sm:$0xff]  }
  0x5c   :  { %1046 = vmatprep.subr.bf16.mxu0 %v1448_v1  ;;  %1054 = vmatprep.subr.bf16.mxu1 %v1448_v1  ;;  %v1187_v13 = vld [vmem:[#allocation9 + $0x38] sm:$0xff]   ;;  %v1188_v14 = vld [vmem:[#allocation9 + $0x30] sm:$0xff]   ;;  %v943_v15 = vld [vmem:[%s1672_s2] ss:$0 sm:$0xff] }
  0x5d   :  { %v1189_v25 = vld [vmem:[#allocation9 + $0x28] sm:$0xff]   ;;  %v1190_v26 = vld [vmem:[#allocation9 + $0x20] sm:$0xff]   ;;  %v1191_v27 = vld [vmem:[#allocation9 + $0x18] sm:$0xff]  }
  0x5e   :  { %v1192_v28 = vld [vmem:[#allocation9 + $0x10] sm:$0xff]   ;;  %v1193_v29 = vld [vmem:[#allocation9 + $0x8] sm:$0xff]   ;;  %v1194_v30 = vld [vmem:[#allocation9] sm:$0xff]  }
  0x5f   :  { %1047 = vmatpush3.bf16.msra.mxu0 %v1177_v3  ;;  %1055 = vmatpush3.bf16.msra.mxu1 %v1180_v6  ;;  %v1195_v31 = vld [vmem:[#allocation11 + $0x38] sm:$0xff]   ;;  %v1196_v32 = vld [vmem:[#allocation11 + $0x30] sm:$0xff]   ;;  %v1197_v33 = vld [vmem:[#allocation11 + $0x28] sm:$0xff]  }
  0x60   :  { %1072 = vmatprep.subr.bf16.mxu0 %v1448_v1  ;;  %1056 = vmatprep.subr.bf16.mxu1 %v1448_v1  ;;  %v948_v34 = vld [vmem:[%s1674_s4] ss:$0 sm:$0xff]  ;;  %v1199_v45 = vld [vmem:[#allocation11 + $0x18] sm:$0xff]   ;;  %v1200_v46 = vld [vmem:[#allocation11 + $0x10] sm:$0xff]  }
  0x61   :  { %v1198_v44 = vld [vmem:[#allocation11 + $0x20] sm:$0xff]   ;;  %v1201_v47 = vld [vmem:[#allocation11 + $0x8] sm:$0xff]   ;;  %v1211_v49 = vld [vmem:[#allocation12 + $0x38] sm:$0xff]  }
  0x62   :  { %1049 = vmatmul.mubr.msk.bf16.vlgmr.msra.gmra.mxu0 %vm182_vm1, %v1178_v5  ;;  %v1202_v48 = vld [vmem:[#allocation11] sm:$0xff]   ;;  %v1212_v50 = vld [vmem:[#allocation12 + $0x30] sm:$0xff]   ;;  %v1203_v60 = vld [vmem:[#allocation14 + $0x38] sm:$0xff]  }
  0x63   :  { %1088 = vmatprep.mubr.msk.bf16.mxu0 %vm1449_vm0, %v1448_v1  ;;  %1057 = vmatpush3.bf16.msra.mxu1 %v1181_v7  ;;  %v957_v51 = vld [vmem:[%s1676_s6] ss:$0 sm:$0xff]  ;;  %v1204_v62 = vld [vmem:[#allocation14 + $0x30] sm:$0xff]   ;;  %v1205_v63 = vld [vmem:[#allocation14 + $0x28] sm:$0xff]  }
  0x64   :  { %1058 = vmatprep.subr.bf16.mxu1 %v1448_v1  ;;  %1073 = vmatpush3.bf16.msra.mxu0 %v1187_v13  ;;  %v1206_v0 = vld [vmem:[#allocation14 + $0x20] sm:$0xff]   ;;  %v1207_v2 = vld [vmem:[#allocation14 + $0x18] sm:$0xff]   ;;  %v1208_v3 = vld [vmem:[#allocation14 + $0x10] sm:$0xff]  }
  0x65   :  { %1074 = vmatprep.subr.bf16.mxu0 %v1448_v1  ;;  %v1209_v4 = vld [vmem:[#allocation14 + $0x8] sm:$0xff]   ;;  %v1210_v5 = vld [vmem:[#allocation14] sm:$0xff]  }
  0x66   :  { %v1213_v6 = vld [vmem:[#allocation12 + $0x28] sm:$0xff]   ;;  %v1214_v7 = vld [vmem:[#allocation12 + $0x20] sm:$0xff]  }
  0x67   :  { %1059 = vmatpush3.bf16.msra.mxu1 %v1182_v8  ;;  %v1215_v8 = vld [vmem:[#allocation12 + $0x18] sm:$0xff]  }
  0x68   :  { %1060 = vmatprep.subr.bf16.mxu1 %v1448_v1  ;;  %1075 = vmatpush3.bf16.msra.mxu0 %v1188_v14 }
  0x69   :  { %1076 = vmatprep.subr.bf16.mxu0 %v1448_v1 }
  0x6b   :  { %1061 = vmatpush3.bf16.msra.mxu1 %v1183_v9  ;;  %v1216_v9 = vld [vmem:[#allocation12 + $0x10] sm:$0xff]  }
  0x6c   :  { %1062 = vmatprep.subr.bf16.mxu1 %v1448_v1  ;;  %1077 = vmatpush3.bf16.msra.mxu0 %v1189_v25 }
  0x6d   :  { %1078 = vmatprep.subr.bf16.mxu0 %v1448_v1 }
  0x6f   :  { %1063 = vmatpush3.bf16.msra.mxu1 %v1184_v10  ;;  %v1217_v10 = vld [vmem:[#allocation12 + $0x8] sm:$0xff]  }
  0x70   :  { %1064 = vmatprep.subr.bf16.mxu1 %v1448_v1  ;;  %1079 = vmatpush3.bf16.msra.mxu0 %v1190_v26 }
  0x71   :  { %1080 = vmatprep.subr.bf16.mxu0 %v1448_v1 }
  0x73   :  { %1065 = vmatpush3.bf16.msra.mxu1 %v1185_v11  ;;  %v1218_v11 = vld [vmem:[#allocation12] sm:$0xff]  }
  0x74   :  { %1066 = vmatprep.subr.bf16.mxu1 %v1448_v1  ;;  %1081 = vmatpush3.bf16.msra.mxu0 %v1191_v27 }
  0x75   :  { %1082 = vmatprep.subr.bf16.mxu0 %v1448_v1 }
  0x77   :  { %1067 = vmatpush3.bf16.msra.mxu1 %v1186_v12  ;;  %v966_v12 = vld [vmem:[%s1678_s8] ss:$0 sm:$0xff] }
  0x78   :  { %1092 = vmatprep.subr.bf16.mxu1 %v1448_v1  ;;  %1083 = vmatpush3.bf16.msra.mxu0 %v1192_v28 }
  0x79   :  { %1084 = vmatprep.subr.bf16.mxu0 %v1448_v1 }
  0x7c   :  { %1085 = vmatpush3.bf16.msra.mxu0 %v1193_v29 }
  0x7d   :  { %1086 = vmatprep.subr.bf16.mxu0 %v1448_v1 }
  0x80   :  { %1087 = vmatpush3.bf16.msra.mxu0 %v1194_v30 }
  0x81   :  { %1112 = vmatprep.subr.bf16.mxu0 %v1448_v1 }
 0x122   :  { %v220_v16 = vpop.f32.mrf.mxu0 }
 0x123   :  { %v221_v17 = vadd.f32 %v943_v15, %v220_v16 }
 0x124   :  { %v1050_v18 = vpop.f32.mrf.mxu0 }
 0x125   :  { %1219 = vtanh.f32 %v221_v17 }
 0x126   :  { %v223_v19 = vpop.f32.mrf.mxu0 }
 0x127   :  { %v224_v20 = vadd.f32 %v943_v15, %v223_v19 }
 0x128   :  { %v1051_v21 = vpop.f32.mrf.mxu0 }
 0x129   :  { %1221 = vtanh.f32 %v224_v20 }
 0x132   :  { %v1220_v22 = vpop.eup %1219 }
 0x136   :  { %v1222_v23 = vpop.eup %1221 }
 0x137   :  { %v229_v24 = vpack.c.bf16 %v1222_v23, %v1220_v22 }
 0x139   :  { %1069 = vmatmul.mubr.bf16.vlgmr.msra.gmra.mxu1 %v229_v24  ;;  %v984_v24 = vld [vmem:[%s1682_s12] ss:$0 sm:$0xff] }
 0x13a   :  { %1108 = vmatprep.mubr.msk.bf16.mxu1 %vm1449_vm0, %v1448_v1  ;;  %1093 = vmatpush3.bf16.msra.mxu1 %v1195_v31  ;;  %v826_v31 = vld [vmem:[%s1683_s13] sm:$0x1] }
 0x13b   :  { %1094 = vmatprep.subr.bf16.mxu1 %v1448_v1 }
 0x13e   :  { %1095 = vmatpush3.bf16.msra.mxu1 %v1196_v32  ;;  %v687_v32 = vlaneseq }
 0x13f   :  { %1096 = vmatprep.subr.bf16.mxu1 %v1448_v1 }
 0x142   :  { %1097 = vmatpush3.bf16.msra.mxu1 %v1197_v33  ;;  %v688_v33 = vand.u32 127, %v687_v32 }
 0x143   :  { %1098 = vmatprep.subr.bf16.mxu1 %v1448_v1 }
 0x144   :  { %vm689_vm2 = vcmp.lt.s32.totalorder %v688_v33, 4 }
 0x146   :  { %1099 = vmatpush3.bf16.msra.mxu1 %v1198_v44 }
 0x147   :  { %1100 = vmatprep.subr.bf16.mxu1 %v1448_v1 }
 0x14a   :  { %1101 = vmatpush3.bf16.msra.mxu1 %v1199_v45 }
 0x14b   :  { %1102 = vmatprep.subr.bf16.mxu1 %v1448_v1 }
 0x14e   :  { %1103 = vmatpush3.bf16.msra.mxu1 %v1200_v46 }
 0x14f   :  { %1104 = vmatprep.subr.bf16.mxu1 %v1448_v1 }
 0x152   :  { %1105 = vmatpush3.bf16.msra.mxu1 %v1201_v47 }
 0x153   :  { %1106 = vmatprep.subr.bf16.mxu1 %v1448_v1 }
 0x156   :  { %1107 = vmatpush3.bf16.msra.mxu1 %v1202_v48 }
 0x157   :  { %1132 = vmatprep.subr.bf16.mxu1 %v1448_v1 }
 0x1f9   :  { %v335_v35 = vpop.f32.mrf.mxu1 }
 0x1fa   :  { %v336_v36 = vadd.f32 %v948_v34, %v335_v35 }
 0x1fb   :  { %v1070_v37 = vpop.f32.mrf.mxu1 }
 0x1fc   :  { %1223 = vtanh.f32 %v336_v36 }
 0x1fd   :  { %v338_v38 = vpop.f32.mrf.mxu1 }
 0x1fe   :  { %v339_v39 = vadd.f32 %v948_v34, %v338_v38  ;;  %v975_v34 = vld [vmem:[%s1680_s10] ss:$0 sm:$0xff]  ;;  %s1451_s10 = smov [#allocation16]  }
 0x1ff   :  { %v1071_v40 = vpop.f32.mrf.mxu1  ;;  %s927_s13 = sshll.u32 %s1451_s10, 4  ;;  %s928_s13 = int_to_ptr.vmem [resolvable:$true] %s927_s13 }
 0x200   :  { %1225 = vtanh.f32 %v339_v39  ;;  %s1387_s0 = scalar_lea.vmem %s928_s13, 16  ;;  %s1391_s17 = scalar_lea.vmem %s928_s13, 32 }
 0x201   :  { %p1388_p7 = scmp.ne.s32.totalorder %s928_s13, %s1387_s0  ;;  %p1392_p8 = scmp.lt.s32.totalorder %s928_s13, %s928_s13 }
 0x202   :  { %p1393_p9 = scmp.lt.s32.totalorder %s1391_s17, %s1387_s0 }
 0x204   :  { %p1394_p10 = por %p1393_p9, %p1392_p8 }
 0x206   :  { %p1395_p11 = pnand %p1394_p10, %p1388_p7 }
 0x209   :  { %v1224_v41 = vpop.eup %1223 }
 0x20d   :  { %v1226_v42 = vpop.eup %1225 }
 0x20e   :  { %v344_v43 = vpack.c.bf16 %v1226_v42, %v1224_v41  ;;  %v827_v42 = vld [vmem:[#allocation2] sm:$0x1] }
 0x210   :  { %1089 = vmatmul.mubr.bf16.vlgmr.msra.gmra.mxu0 %v344_v43  ;;  %v1450_v43 = vmov 0  }
 0x211   :  { %1128 = vmatprep.mubr.msk.bf16.mxu0 %vm1449_vm0, %v1448_v1  ;;  %1113 = vmatpush3.bf16.msra.mxu0 %v1211_v49 }
 0x212   :  { %1114 = vmatprep.subr.bf16.mxu0 %v1448_v1  ;;  %1175 = vset.pattern.permute.xlu0 %v1450_v43 }
 0x215   :  { %1115 = vmatpush3.bf16.msra.mxu0 %v1212_v50 }
 0x216   :  { %1116 = vmatprep.subr.bf16.mxu0 %v1448_v1 }
 0x219   :  { %1117 = vmatpush3.bf16.msra.mxu0 %v1213_v6 }
 0x21a   :  { %1118 = vmatprep.subr.bf16.mxu0 %v1448_v1 }
 0x21d   :  { %1119 = vmatpush3.bf16.msra.mxu0 %v1214_v7 }
 0x21e   :  { %1120 = vmatprep.subr.bf16.mxu0 %v1448_v1 }
 0x221   :  { %1121 = vmatpush3.bf16.msra.mxu0 %v1215_v8 }
 0x222   :  { %1122 = vmatprep.subr.bf16.mxu0 %v1448_v1 }
 0x225   :  { %1123 = vmatpush3.bf16.msra.mxu0 %v1216_v9 }
 0x226   :  { %1124 = vmatprep.subr.bf16.mxu0 %v1448_v1 }
 0x229   :  { %1125 = vmatpush3.bf16.msra.mxu0 %v1217_v10 }
 0x22a   :  { %1126 = vmatprep.subr.bf16.mxu0 %v1448_v1 }
 0x22d   :  { %1127 = vmatpush3.bf16.msra.mxu0 %v1218_v11 }
 0x22e   :  { %1152 = vmatprep.subr.mxu0 %v1448_v1 }
 0x2d0   :  { %v450_v52 = vpop.f32.mrf.mxu0 }
 0x2d1   :  { %v451_v53 = vadd.f32 %v957_v51, %v450_v52 }
 0x2d2   :  { %v1090_v54 = vpop.f32.mrf.mxu0 }
 0x2d3   :  { %1227 = vtanh.f32 %v451_v53  ;;  %v834_v53 = vshrl.u32 %v687_v32, 7 }
 0x2d4   :  { %v453_v55 = vpop.f32.mrf.mxu0 }
 0x2d5   :  { %v454_v56 = vadd.f32 %v957_v51, %v453_v55  ;;  %v835_v55 = vsub.s32 0, %v834_v53 }
 0x2d6   :  { %v1091_v57 = vpop.f32.mrf.mxu0 }
 0x2d7   :  { %1229 = vtanh.f32 %v454_v56 }
 0x2e0   :  { %v1228_v58 = vpop.eup %1227 }
 0x2e4   :  { %v1230_v59 = vpop.eup %1229 }
 0x2e5   :  { %v459_v61 = vpack.c.bf16 %v1230_v59, %v1228_v58 }
 0x2e7   :  { %1109 = vmatmul.mubr.bf16.vlgmr.msra.gmra.mxu1 %v459_v61 }
 0x2e8   :  { %1133 = vmatpush3.bf16.msra.mxu1 %v1203_v60  ;;  %1148 = vmatprep.mubr.msk.bf16.mxu1 %vm1449_vm0, %v1448_v1 }
 0x2e9   :  { %1134 = vmatprep.subr.bf16.mxu1 %v1448_v1 }
 0x2ec   :  { %1135 = vmatpush3.bf16.msra.mxu1 %v1204_v62 }
 0x2ed   :  { %1136 = vmatprep.subr.bf16.mxu1 %v1448_v1 }
 0x2f0   :  { %1137 = vmatpush3.bf16.msra.mxu1 %v1205_v63 }
 0x2f1   :  { %1138 = vmatprep.subr.bf16.mxu1 %v1448_v1 }
 0x2f4   :  { %1139 = vmatpush3.bf16.msra.mxu1 %v1206_v0 }
 0x2f5   :  { %1140 = vmatprep.subr.bf16.mxu1 %v1448_v1 }
 0x2f8   :  { %1141 = vmatpush3.bf16.msra.mxu1 %v1207_v2 }
 0x2f9   :  { %1142 = vmatprep.subr.bf16.mxu1 %v1448_v1 }
 0x2fc   :  { %1143 = vmatpush3.bf16.msra.mxu1 %v1208_v3 }
 0x2fd   :  { %1144 = vmatprep.subr.bf16.mxu1 %v1448_v1 }
 0x300   :  { %1145 = vmatpush3.bf16.msra.mxu1 %v1209_v4 }
 0x301   :  { %1146 = vmatprep.subr.bf16.mxu1 %v1448_v1 }
 0x304   :  { %1147 = vmatpush3.bf16.msra.mxu1 %v1210_v5 }
 0x307   :  { %1149 = vmatmul.mubr.bf16.vlgmr.msra.gmra.mxu1 %v459_v61 }
 0x3a7   :  { %v565_v13 = vpop.f32.mrf.mxu1 }
 0x3a8   :  { %v566_v14 = vadd.f32 %v966_v12, %v565_v13 }
 0x3a9   :  { %v1110_v15 = vpop.f32.mrf.mxu1 }
 0x3aa   :  { %1231 = vtanh.f32 %v566_v14 }
 0x3ab   :  { %v568_v16 = vpop.f32.mrf.mxu1 }
 0x3ac   :  { %v569_v17 = vadd.f32 %v966_v12, %v568_v16 }
 0x3ad   :  { %v1111_v18 = vpop.f32.mrf.mxu1 }
 0x3ae   :  { %1233 = vtanh.f32 %v569_v17 }
 0x3b7   :  { %v1232_v19 = vpop.eup %1231 }
 0x3bb   :  { %v1234_v20 = vpop.eup %1233 }
 0x3bc   :  { %v574_v21 = vpack.c.bf16 %v1234_v20, %v1232_v19 }
 0x3be   :  { %1129 = vmatmul.mubr.bf16.vlgmr.msra.gmra.mxu0 %v574_v21 }
 0x3bf   :  { %1156 = vmatprep.mubr.msk.f32.mxu0 %vm1449_vm0, %v1448_v1 }
 0x3c7   :  { %v817_v22 = vpop.f32.mrf.mxu1 }
 0x3c8   :  { %v818_v28 = vadd.f32 %v984_v24, %v817_v22 }
 0x3c9   :  { %v1150_v23 = vpop.f32.mrf.mxu1 }
 0x3cb   :  { %v820_v25 = vpop.f32.mrf.mxu1 }
 0x3cc   :  { %v821_v26 = vadd.f32 %v984_v24, %v820_v25 }
 0x3cd   :  { %v1151_v27 = vpop.f32.mrf.mxu1 }
 0x3ce   :  { %1235 = vtanh.f32 %v821_v26 }
 0x3cf   :  { %1237 = vtanh.f32 %v818_v28 }
 0x3db   :  { %v1236_v29 = vpop.eup %1235 }
 0x3dc   :  { %1153 = vmatpush3.xpose.msra.mxu0 %v1236_v29  ;;  %v1238_v30 = vpop.eup %1237 }
 0x3dd   :  { %1154 = vmatprep.subr.mxu0 %v1448_v1 }
 0x3e0   :  { %1155 = vmatpush3.xpose.msra.mxu0 %v1238_v30 }
 0x3e3   :  { %1157 = vmatmul.mubr.f32.vlgmr.msra.gmra.mxu0 %v826_v31 }
 0x47e   :  { %v680_v35 = vpop.f32.mrf.mxu0 }
 0x47f   :  { %v681_v36 = vadd.f32 %v975_v34, %v680_v35 }
 0x480   :  { %v1130_v37 = vpop.f32.mrf.mxu0 }
 0x481   :  { %v690_v38 = vsel %vm689_vm2, %v681_v36, -1e+30 }
 0x482   :  { %692 = vmax.xlane.f32.xlu0 %v690_v38  ;;  %v683_v1 = vpop.f32.mrf.mxu0 }
 0x483   :  { %v684_v39 = vadd.f32 %v975_v34, %v683_v1 }
 0x484   :  { %v1131_v40 = vpop.f32.mrf.mxu0 }
 0x485   :  { %v691_v41 = vsel %vm689_vm2, %v684_v39, -1e+30 }
 0x486   :  { %694 = vmax.xlane.f32.xlu0 %v691_v41 }
 0x49c   :  { %830 = vperm.xlu0 %1175, %v827_v42  }
 0x4a3   :  { %v903_v52 = vpop.f32.mrf.mxu0 }
 0x4a5   :  { %v1158_v54 = vpop.f32.mrf.mxu0 }
 0x50b   :  { %v693_v44 = vpop.xlane.xlu0 %692 }
 0x50c   :  { %v696_v45 = vsub.f32 %v690_v38, %v693_v44 }
 0x50e   :  { %v698_v46 = vmul.f32 1.442695, %v696_v45 }
 0x50f   :  { %v695_v47 = vpop.xlane.xlu0 %694 }
 0x510   :  { %1239 = vpow2.f32 %v698_v46  ;;  %v697_v48 = vsub.f32 %v691_v41, %v695_v47 }
 0x512   :  { %v700_v49 = vmul.f32 1.442695, %v697_v48 }
 0x514   :  { %1241 = vpow2.f32 %v700_v49 }
 0x517   :  { %v831_v56 = vpop.permute.xlu0 %830 }
 0x518   :  { %v836_v57 = vrot.slane %v831_v56, %v835_v55 }
 0x51a   :  { %v904_v58 = vadd.f32 %v903_v52, %v836_v57 }
 0x51c   :  { %908 = vst.msk [vmem:[#allocation16] sm:$0x1] %vm907_vm3, %v904_v58 }
 0x51d   :  { %v1240_v50 = vpop.eup %1239 }
 0x51e   :  { %702 = vadd.xlane.f32.xlu1 %v1240_v50 }
 0x521   :  { %v1242_v51 = vpop.eup %1241 }
 0x522   :  { %704 = vadd.xlane.f32.xlu1 %v1242_v51 }
 0x523   :  { %1398 = shalt.err (!%p1395_p11)
}
 0x524   :  { %930 = dma.vmem_to_hbm [thread:$0]  %s928_s13, 16, %s1686_s16, [#allocation17]  }
 0x525   :  { %s1452_s19 = smov [#allocation15]  }
 0x526   :  { %s914_s20 = sshll.u32 %s1452_s19, 4  ;;  %s915_s20 = int_to_ptr.vmem [resolvable:$true] %s914_s20 }
 0x527   :  { %s1407_s21 = scalar_lea.vmem %s915_s20, 256  ;;  %p1412_p13 = scmp.lt.s32.totalorder %s915_s20, %s915_s20 }
 0x528   :  { %p1408_p12 = scmp.ne.s32.totalorder %s915_s20, %s1407_s21  ;;  %p1413_p0 = scmp.lt.s32.totalorder %s1407_s21, %s1407_s21 }
 0x52a   :  { %p1414_p1 = por %p1413_p0, %p1412_p13 }
 0x52c   :  { %p1415_p2 = pnand %p1414_p1, %p1408_p12 }
 0x5a7   :  { %v703_v59 = vpop.xlane.xlu1 %702 }
 0x5a8   :  { %1243 = vrcp.f32 %v703_v59 }
 0x5ab   :  { %v705_v60 = vpop.xlane.xlu1 %704 }
 0x5ac   :  { %1245 = vrcp.f32 %v705_v60 }
 0x5b5   :  { %v1244_v61 = vpop.eup %1243 }
 0x5b6   :  { %v708_v62 = vmul.f32 %v1244_v61, %v1240_v50 }
 0x5b8   :  { %710 = vst [vmem:[#allocation15] sm:$0xff] %v708_v62 }
 0x5b9   :  { %v1246_v63 = vpop.eup %1245 }
 0x5ba   :  { %v709_v0 = vmul.f32 %v1246_v63, %v1242_v51 }
 0x5bc   :  { %711 = vst [vmem:[#allocation15 + $0x8] sm:$0xff] %v709_v0 }
 0x5bd   :  { %1418 = shalt.err (!%p1415_p2)
}
 0x5be   :  { %s1453_s16 = smov 128   ;;  %s1454_s22 = smov 8  }
 0x5bf   :  { %920 = dma.vmem_to_hbm [thread:$0]  %s915_s20, 256, %s1685_s15, [#allocation5], %s1453_s16, %s1453_s16, %s1454_s22  }
 0x5c0   :  { %1435 = dma.done.wait [#allocation5], 256  }
 0x5c1   :  { %1436 = vsyncadd [#allocation5], 4294967040 }
 0x5c2   :  { %1437 = dma.done.wait [#allocation17], 16  }
 0x5c3   :  { %1438 = vsyncadd [#allocation17], 4294967280 }
 0x5c4   :  { %937 = vsyncpa [#allocation4], 1 }
 0x5c5   :  { %938 = vsyncpa [#allocation7], 1 }
 0x5c6   :  { %939 = vsyncpa [#allocation10], 1 }
 0x5c7   :  { %940 = vsyncpa [#allocation13], 1 }
 0x5c8   :  { %941 = vsyncpa [#allocation5], 1 }
 0x5c9   :  { %942 = vsyncpa [#allocation17], 1 }

</bundles_post_ra>
